<compile_context>
chip_gen: v6e
topology: v6e:2x2x1
jax: 0.10.0
libtpu: 0.0.40
codegen_flags: <defaults>
</compile_context>

<pallas_src>
import jax
import jax.numpy as jnp
from jax.experimental import pallas as pl
from jax.experimental.pallas import tpu as pltpu


_LANE = 128
_PALLAS_MIN_FLOPS = 10_000_000  # below this, XLA's fused dot wins


def _round_up(a, b):
    return (a + b - 1) // b * b


def _pick_tile(padded, cap, granule):
    """Largest multiple of `granule` that divides `padded` and is <= cap."""
    best = granule
    t = granule
    limit = min(cap, padded)
    while t <= limit:
        if padded % t == 0:
            best = t
        t += granule
    return best


def _linear_kernel_onepass(x_ref, w_ref, o_ref):
    # Full K in one block: no accumulator scratch, no phase gating.
    o_ref[...] = jnp.dot(
        x_ref[...], w_ref[...], preferred_element_type=jnp.float32
    ).astype(o_ref.dtype)


def _linear_kernel_kloop(x_ref, w_ref, o_ref, acc_ref):
    # grid = (M//tm, N//tn, Kp//tk); K is the sequential reduction axis.
    @pl.when(pl.program_id(2) == 0)
    def _():
        acc_ref[...] = jnp.zeros_like(acc_ref)

    acc_ref[...] += jnp.dot(
        x_ref[...], w_ref[...], preferred_element_type=jnp.float32
    )

    @pl.when(pl.program_id(2) == pl.num_programs(2) - 1)
    def _():
        o_ref[...] = acc_ref[...].astype(o_ref.dtype)


def pallas_linear_no_bias(x2d, w_kn, *, out_features=None, tm=None, tn=None, tk=None):
    """y = x2d @ w_kn (no bias).

    x2d:  [M, K]
    w_kn: [Kp, Np] with Kp/Np multiples of 128 (zero-padded, pre-padded once at
          model construction). Un-padded weights are accepted and padded here
          as a fallback.
    out_features: true N (defaults to Np).
    """
    M, K = x2d.shape
    Kp, Np = w_kn.shape
    in_dtype = x2d.dtype
    itemsize = jnp.dtype(in_dtype).itemsize

    # Fallback only (the model pre-pads, so this branch is dead there).
    if (Kp % _LANE) or (Np % _LANE):
        Kp2, Np2 = _round_up(Kp, _LANE), _round_up(Np, _LANE)
        w_kn = jnp.pad(w_kn, ((0, Kp2 - Kp), (0, Np2 - Np)))
        Kp, Np = Kp2, Np2
    N = Np if out_features is None else out_features
    assert K <= Kp and N <= Np, "weight does not cover the requested K/N"

    # ---- tile selection (no data movement) --------------------------------
    TM_CAP, TN_CAP, TK_CAP, ONEPASS_K_CAP = 512, 512, 2048, 4096
    m_gran = max(8, 32 // itemsize)  # f32: 8, bf16: 16, int8/fp8: 32

    if tn is None:
        tn = _pick_tile(Np, TN_CAP, _LANE)
    assert Np % tn == 0 and tn % _LANE == 0

    Mp = _round_up(M, m_gran)
    if tm is None:
        tm = _pick_tile(Mp, TM_CAP, m_gran)
        # A degenerate divisor for awkward M would re-stream W Mp/tm times;
        # prefer a little extra zero padding instead.
        if tm < 128 and Mp > 256:
            tm = 256
            Mp = _round_up(M, tm)
    else:
        Mp = _round_up(M, tm)
    assert Mp % tm == 0 and tm % 8 == 0

    if tk is None:
        onepass_ws = (2 * (tm * Kp + Kp * tn) + 2 * tm * tn) * itemsize
        if Kp <= ONEPASS_K_CAP and onepass_ws <= 40 * 1024 * 1024:
            tk = Kp  # fold K into a single step: no scratch, no phase gating
        else:
            tk = _pick_tile(Kp, TK_CAP, _LANE)
    assert Kp % tk == 0 and tk % _LANE == 0
    one_pass = tk == Kp

    grid_m, grid_n, grid_k = Mp // tm, Np // tn, Kp // tk

    # v7x has 2 TensorCores: ensure the parallel grid has >= 2 steps so the
    # second core isn't idle (negligible cost on single-TC v5e/v6e).
    if one_pass and grid_m * grid_n == 1:
        if tn % 256 == 0:
            tn //= 2
            grid_n = 2
        elif tm % (2 * m_gran) == 0:
            tm //= 2
            grid_m = 2

    # When the weight dominates HBM traffic and there are several M tiles, put
    # M innermost so each weight column-block is DMA'd exactly once.
    w_bytes = Kp * Np * itemsize
    x_bytes = Mp * Kp * itemsize
    w_resident = one_pass and grid_m > 1 and w_bytes > x_bytes

    # ---- pad activations (single pad op, usually a no-op) ------------------
    if (Mp, Kp) != (M, K):
        x2d = jnp.pad(x2d, ((0, Mp - M), (0, Kp - K)))

    # ---- cost / vmem hints --------------------------------------------------
    if one_pass:
        x_reads, w_reads = (grid_n, 1) if w_resident else (1, grid_m)
    else:
        x_reads, w_reads = grid_n, grid_m
    cost = pl.CostEstimate(
        flops=2 * Mp * Np * Kp,
        transcendentals=0,
        bytes_accessed=(x_reads * Mp * Kp + w_reads * Kp * Np + Mp * Np) * itemsize,
    )
    vmem_need = (2 * (tm * tk + tk * tn) + 2 * tm * tn) * itemsize
    if not one_pass:
        vmem_need += tm * tn * 4 + tk * tn * itemsize  # f32 acc + 3rd W buffer
    vmem_limit = int(min(64 * 1024 * 1024, max(32 * 1024 * 1024, 2 * vmem_need)))

    if one_pass:
        if w_resident:
            grid = (grid_n, grid_m)  # M innermost: W column-block fetched once
            x_spec = pl.BlockSpec((tm, Kp), lambda j, i: (i, 0))
            w_spec = pl.BlockSpec((Kp, tn), lambda j, i: (0, j))
            o_spec = pl.BlockSpec((tm, tn), lambda j, i: (i, j))
        else:
            grid = (grid_m, grid_n)  # N innermost: X row-block fetched once
            x_spec = pl.BlockSpec((tm, Kp), lambda i, j: (i, 0))
            w_spec = pl.BlockSpec((Kp, tn), lambda i, j: (0, j))
            o_spec = pl.BlockSpec((tm, tn), lambda i, j: (i, j))
        y = pl.pallas_call(
            _linear_kernel_onepass,
            out_shape=jax.ShapeDtypeStruct((Mp, Np), in_dtype),
            grid_spec=pltpu.PrefetchScalarGridSpec(
                num_scalar_prefetch=0,
                grid=grid,
                in_specs=[x_spec, w_spec],
                out_specs=o_spec,
            ),
            compiler_params=pltpu.CompilerParams(
                dimension_semantics=("parallel", "parallel"),
                vmem_limit_bytes=vmem_limit,
            ),
            cost_estimate=cost,
        )(x2d, w_kn)
    else:
        w_idx = lambda i, j, k: (k, j)
        w_spec = pl.BlockSpec((tk, tn), w_idx)
        if w_bytes > x_bytes or grid_m == 1:
            # Weight stream is the critical path: 3-deep buffer it if supported.
            try:
                w_spec = pl.BlockSpec((tk, tn), w_idx, pipeline_mode=pl.Buffered(3))
            except (TypeError, AttributeError):
                pass
        y = pl.pallas_call(
            _linear_kernel_kloop,
            out_shape=jax.ShapeDtypeStruct((Mp, Np), in_dtype),
            grid_spec=pltpu.PrefetchScalarGridSpec(
                num_scalar_prefetch=0,
                grid=(grid_m, grid_n, grid_k),
                in_specs=[
                    pl.BlockSpec((tm, tk), lambda i, j, k: (i, k)),
                    w_spec,
                ],
                out_specs=pl.BlockSpec((tm, tn), lambda i, j, k: (i, j)),
                scratch_shapes=[pltpu.VMEM((tm, tn), jnp.float32)],
            ),
            compiler_params=pltpu.CompilerParams(
                dimension_semantics=("parallel", "parallel", "arbitrary"),
                vmem_limit_bytes=vmem_limit,
            ),
            cost_estimate=cost,
        )(x2d, w_kn)

    if (Mp, Np) != (M, N):
        y = y[:M, :N]
    return y


class ParallelSampleModelPallas:
    """JAX/Pallas equivalent of ParallelSampleModel (world_size == 1)."""
    # TODO(synk): world_size > 1 row-sharding + cross-device all-reduce of
    # RowParallelLinear is not implemented; single-device semantics only.

    def __init__(self, weights_dtype, input_size, output_size, key):
        # nn.Linear-style weight: [output_size, input_size] = [N, K]
        self.weight = (
            jax.random.normal(key, (output_size, input_size), dtype=jnp.float32)
            * 0.02
        ).astype(weights_dtype)
        # One-time layout prep for the Pallas path: transpose to [K, N] and pad
        # K/N to lane (128) granularity so no per-forward pad/copy is emitted.
        K, N = input_size, output_size
        Kp, Np = _round_up(K, _LANE), _round_up(N, _LANE)
        w_kn = jnp.transpose(self.weight)
        if (Kp, Np) != (K, N):
            w_kn = jnp.pad(w_kn, ((0, Kp - K), (0, Np - N)))
        self.weight_kn = w_kn
        self.input_size = input_size
        self.output_size = output_size

    def __call__(self, x):
        # x: [batch, seq, input_size]
        B, S, K = x.shape
        M = B * S
        x2d = x.reshape(M, K)
        if 2 * M * self.output_size * K < _PALLAS_MIN_FLOPS:
            # Tiny/decode shapes: pallas launch + pad/slice would dominate; let
            # XLA's fused dot handle it (contract on K of both operands, no
            # transpose materialized).
            y2d = jax.lax.dot_general(
                x2d, self.weight, (((1,), (1,)), ((), ())),
                preferred_element_type=jnp.float32,
            ).astype(x.dtype)
        else:
            y2d = pallas_linear_no_bias(
                x2d, self.weight_kn, out_features=self.output_size
            )
        return y2d.reshape(B, S, self.output_size)


if __name__ == "__main__":
    key = jax.random.PRNGKey(0)
    k_w, k_a, k_b, k_c = jax.random.split(key, 4)
    dtype = jnp.bfloat16

    def ref_forward(model, x):
        return jnp.einsum(
            "bsk,nk->bsn",
            x.astype(jnp.float32),
            model.weight.astype(jnp.float32),
        ).astype(dtype)

    # Case A: spec-sized tiny shape (fast path: XLA fused dot).
    batch, seq, input_size, output_size = 2, 8, 256, 128
    model_a = ParallelSampleModelPallas(dtype, input_size, output_size, k_w)
    x_a = jax.random.normal(
        k_a, (batch, seq, input_size), dtype=jnp.float32
    ).astype(dtype)
    y_a = jax.block_until_ready(model_a(x_a))
    assert y_a.shape == (batch, seq, output_size)
    assert jnp.allclose(
        y_a.astype(jnp.float32), ref_forward(model_a, x_a).astype(jnp.float32),
        atol=1e-1, rtol=1e-1,
    )

    # Case B: one-pass Pallas path (single K step, grid split so both v7x
    # TensorCores get work).
    batch, seq, input_size, output_size = 2, 128, 512, 512
    model_b = ParallelSampleModelPallas(dtype, input_size, output_size, k_w)
    x_b = jax.random.normal(
        k_b, (batch, seq, input_size), dtype=jnp.float32
    ).astype(dtype)
    y_b = jax.block_until_ready(model_b(x_b))
    assert y_b.shape == (batch, seq, output_size)
    assert jnp.allclose(
        y_b.astype(jnp.float32), ref_forward(model_b, x_b).astype(jnp.float32),
        atol=1e-1, rtol=1e-1,
    )

    # Case C: K-loop Pallas path (f32 accumulator, deep-buffered weight stream),
    # forced via an explicit tk override.
    M, K, N = 64, 2048, 256
    model_c = ParallelSampleModelPallas(dtype, K, N, k_w)
    x_c2d = jax.random.normal(k_c, (M, K), dtype=jnp.float32).astype(dtype)
    y_c = jax.block_until_ready(
        pallas_linear_no_bias(x_c2d, model_c.weight_kn, out_features=N, tk=512)
    )
    ref_c = jnp.dot(
        x_c2d.astype(jnp.float32), model_c.weight.T.astype(jnp.float32)
    ).astype(dtype)
    assert y_c.shape == (M, N)
    assert jnp.allclose(
        y_c.astype(jnp.float32), ref_c.astype(jnp.float32), atol=1e-1, rtol=1e-1
    )

    print("KERNEL_OK")
</pallas_src>

<mosaic_0001>
module attributes {stable_mosaic.version = 11 : i64} {
  func.func @_linear_kernel_onepass(%arg0: i32, %arg1: i32, %arg2: memref<256x512xbf16, #tpu.memory_space<vmem>>, %arg3: memref<512x256xbf16, #tpu.memory_space<vmem>>, %arg4: memref<256x256xbf16, #tpu.memory_space<vmem>>) attributes {dimension_semantics = [#tpu.dimension_semantics<parallel>, #tpu.dimension_semantics<parallel>], iteration_bounds = array<i64: 1, 2>, scalar_prefetch = 0 : i64, scratch_operands = 0 : i64, tpu.core_type = #tpu.core_type<tc>, window_params = [{transform_indices = @transform_0, window_bounds = array<i64: 256, 512>}, {transform_indices = @transform_1, window_bounds = array<i64: 512, 256>}, {transform_indices = @transform_2, window_bounds = array<i64: 256, 256>}]} {
    %c0 = arith.constant 0 : index
    %c0_0 = arith.constant 0 : index
    %0 = vector.load %arg2[%c0, %c0_0] : memref<256x512xbf16, #tpu.memory_space<vmem>>, vector<256x512xbf16>
    %c0_1 = arith.constant 0 : index
    %c0_2 = arith.constant 0 : index
    %1 = vector.load %arg3[%c0_1, %c0_2] : memref<512x256xbf16, #tpu.memory_space<vmem>>, vector<512x256xbf16>
    %cst = arith.constant dense<0.000000e+00> : vector<256x256xf32>
    %2 = tpu.matmul %0, %1, %cst {dimension_numbers = #tpu.dot_dimension_numbers<[1], [0], [0], [1], [0, 0, 1, 1], [], []>} : vector<256x512xbf16>, vector<512x256xbf16>, vector<256x256xf32> -> vector<256x256xf32>
    %3 = arith.truncf %2 : vector<256x256xf32> to vector<256x256xbf16>
    %c0_3 = arith.constant 0 : index
    %c0_4 = arith.constant 0 : index
    %4 = vector.load %arg4[%c0_3, %c0_4] : memref<256x256xbf16, #tpu.memory_space<vmem>>, vector<256x256xbf16>
    tpu.vector_store %arg4[%c0_3, %c0_4], %3 {strides = array<i32>} : memref<256x256xbf16, #tpu.memory_space<vmem>>, vector<256x256xbf16>,
    return
  }
  func.func @transform_0(%arg0: i32, %arg1: i32) -> (i32, i32) {
    %c0_i32 = arith.constant 0 : i32
    %c0_i32_0 = arith.constant 0 : i32
    return %arg0, %c0_i32 : i32, i32
  }
  func.func @transform_1(%arg0: i32, %arg1: i32) -> (i32, i32) {
    %c0_i32 = arith.constant 0 : i32
    %c0_i32_0 = arith.constant 0 : i32
    return %c0_i32, %arg1 : i32, i32
  }
  func.func @transform_2(%arg0: i32, %arg1: i32) -> (i32, i32) {
    %c0_i32 = arith.constant 0 : i32
    return %arg0, %arg1 : i32, i32
  }
}

</mosaic_0001>

<bundles_post_ra>
// kernel: tpu_custom_call.1
= control target key start
LH: loop header
LB: loop body
LE: loop exit
PB: predicated region body
PF: predicated region fallthrough
CT: control target
= control target key end

     0   :  { %7 = vsyncpa [#allocation3], 0  ;;  %s2625_s0 = inlined_call_operand.hbm [shape: bf16[256,512], index: 0, kind: input, shape index: {}]   ;;  %s2626_s1 = inlined_call_operand.hbm [shape: bf16[512,512], index: 1, kind: input, shape index: {}]   ;;  %s2627_s2 = inlined_call_operand.hbm [shape: bf16[256,512], index: 2, kind: output, shape index: {}]  }
   0x1   :  { %8 = vsyncpa [#allocation6], 0 }
   0x2   :  { %10 = vsyncpa [#allocation6 + $0x1], 0 }
   0x3   :  { %11 = vsyncpa [#allocation4], 0 }
   0x4   :  { %13 = vsyncpa [#allocation4 + $0x1], 0  ;;  %s2345_s9 = smov 0   ;;  %s2347_s10 = smov 0  }
   0x5   :  { %s2349_s11 = smov 0   ;;  %s2351_s12 = smov 0  }
   0x6   :  { %s2353_s13 = smov 0   ;;  %s2355_s14 = smov 0  }
   0x7 LB: > { %2632 = sst [smem:[#allocation11_spill]] %s2318_s14  ;;  %s1697_s15 = sadd.s32 4294967295, %s2318_s14   ;;  %s2318_s14 = sphi %s2355_s14, %s2651_s14   ;;  %s2314_s13 = sphi %s2353_s13, %s2650_s13   ;;  %s2310_s12 = sphi %s2351_s12, %s2649_s12   ;;  %s2306_s11 = sphi %s2349_s11, %s2648_s11   ;;  %s2302_s10 = sphi %s2347_s10, %s2647_s10   ;;  %s2298_s9 = sphi %s2345_s9, %s2646_s9  }
   0x8   : > { %s1698_s16 = sadd.s32 4294967294, %s2318_s14   ;;  %p71_p0 = scmp.ne.s32.totalorder %s2306_s11, %s2302_s10 }
   0x9   : > { %p72_p1 = scmp.eq.s32.totalorder %s2318_s14, 0  ;;  %p77_p2 = scmp.ne.s32.totalorder %s2302_s10, %s2298_s9 }
   0xa   : > { %p2382_p3 = scmp.eq.s32.totalorder %s1697_s15, 0  ;;  %p103_p5 = scmp.eq.s32.totalorder %s1697_s15, 1 }
   0xb   : > { %p2386_p4 = por %p72_p1, %p71_p0  ;;  %p109_p7 = scmp.eq.s32.totalorder %s1698_s16, 1 }
   0xc   : > { %p2392_p6 = por %p2382_p3, %p77_p2  ;;  %p2396_p8 = por %p103_p5, %p71_p0 }
   0xd   : > { %p1699_p9 = scmp.ge.s32.totalorder %s2318_s14, 1  ;;  %p2401_p10 = por %p109_p7, %p77_p2 }
   0xe   : > { %s2635_s19 = scalar_select %p2392_p6, 1, 0 }
   0xf   : > { %s2636_s20 = scalar_select %p2396_p8, 1, 0 }
  0x10   : > { %s2637_s21 = scalar_select %p2401_p10, 1, 0 }
  0x11   : > { %p116_p11 = scmp.lt.s32.totalorder %s2318_s14, 3  ;;  %s2320_s23 = smov [#allocation2]  }
  0x12   : > { %s132_s24 = sshll.u32 %s2320_s23, 4  ;;  %p1929_p1 = scmp.lt.s32.totalorder %s2318_s14, 2  ;;  %s133_s24 = int_to_ptr.vmem [resolvable:$true] %s132_s24 }
  0x13   : > { %p2406_p12 = pnand %p1699_p9, %p116_p11  ;;  %s28_s27 = sadd.s32 1, %s2314_s13 }
  0x14   : > { %p2422_p2 = pnand %p1929_p1, %p2386_p4  ;;  %s2191_s28 = scalar_lea.vmem %s133_s24, 8192 }
  0x15   : > { %p1916_p13 = pneg %p2406_p12  ;;  %p2192_p9 = scmp.ne.s32.totalorder %s133_s24, %s2191_s28 }
  0x16   : > { %p2199_p0 = scmp.lt.s32.totalorder %s133_s24, %s133_s24  ;;  %p2200_p8 = scmp.lt.s32.totalorder %s2191_s28, %s2191_s28 }
  0x17   : > { %p2416_p5 = pnand %p1916_p13, %p2382_p3 }
  0x18   : > { %p2201_p6 = por %p2200_p8, %p2199_p0 }
  0x19   : > { %p2182_p7 = pneg %p2416_p5 }
  0x1b   : > { %p2194_p11 = pnand %p2192_p9, %p2182_p7 }
  0x1d   : > { %p2195_p10 = pneg %p2194_p11 }
  0x1f   : > { %p2202_p13 = pnand %p2201_p6, %p2195_p10 }
  0x21   : > { %2205 = shalt.err (!%p2202_p13)
}
  0x22   : > { %s2321_s29 = smov 256   ;;  %s2322_s30 = smov 16  }
  0x23   : > { %1919 = dma.hbm_to_vmem [thread:$0]  (!%p2416_p5), %s2625_s0, 8192, %s133_s24, [#allocation3], %s2321_s29, %s2321_s29, %s2322_s30  }
  0x24   : > { %p29_p4 = scmp.ge.s32.totalorder %s28_s27, 2  ;;  %s64_s5 = sadd.s32 1, %s2306_s11 }
  0x25   : > { %s146_s6 = sand.u32 1, %s2306_s11   ;;  %s1874_s15 = sshll.u32 %s2314_s13, 7 }
  0x26   : > { %s2653_s27 = smov (%p29_p4, %s28_s27), 0  ;;  %s1702_s7 = sshll.u32 %s146_s6, 9 }
  0x27   : > { %s61_s8 = ssub.s32 %s2314_s13, %s2653_s27  ;;  %s156_s23 = scalar_lea.hbm %s2626_s1, %s1874_s15 }
  0x28   : > { %p62_p6 = scmp.eq.s32.totalorder %s61_s8, 0  ;;  %s150_s25 = scalar_lea.vmem [#allocation5], %s1702_s7 }
  0x29   : > { %s157_s28 = sshll.u32 %s150_s25, 4  ;;  %s147_s24 = scalar_lea.sflag [#allocation6], %s146_s6  ;;  %s158_s28 = int_to_ptr.vmem [resolvable:$true] %s157_s28 }
  0x2a   : > { %s2447_s14 = scalar_select %p62_p6, %s2306_s11, %s64_s5  }
  0x2b   : > { %p2208_p8 = pneg %p2422_p2  ;;  %s2219_s30 = scalar_lea.vmem %s158_s28, 8192 }
  0x2c   : > { %p2220_p10 = scmp.ne.s32.totalorder %s158_s28, %s2219_s30  ;;  %s2323_s3 = smov [#allocation5]  }
  0x2d   : > { %s2224_s4 = sshll.u32 %s2323_s3, 4  ;;  %s2225_s4 = int_to_ptr.vmem [resolvable:$false] %s2224_s4 }
  0x2e   : > { %p2222_p0 = pnand %p2220_p10, %p2208_p8  ;;  %s2226_s8 = scalar_lea.vmem %s2225_s4, 16384 }
  0x2f   : > { %p2227_p5 = scmp.lt.s32.totalorder %s158_s28, %s2225_s4  ;;  %p2228_p7 = scmp.lt.s32.totalorder %s2226_s8, %s2219_s30 }
  0x30   : > { %p2223_p1 = pneg %p2222_p0 }
  0x31   : > { %p2229_p9 = por %p2228_p7, %p2227_p5 }
  0x33   : > { %p2230_p11 = pnand %p2229_p9, %p2223_p1 }
  0x35   : > { %2233 = shalt.err (!%p2230_p11)
}
  0x36   : > { %s2324_s7 = smov 128   ;;  %s2325_s5 = smov 8  }
  0x37   : > { %1923 = dma.hbm_to_vmem [thread:$0]  (!%p2422_p2), %s156_s23, 8192, %s158_s28, %s147_s24, %s2321_s29, %s2324_s7, %s2325_s5  }
  0x38   : > { %169 = sbr.rel (%p2406_p12) target bundleno = 470 (0x1d6), region = 28 }
  0x3d   : > { %2285 = dma.done.wait (%p2382_p3), [#allocation3], 8192  }
  0x3e   : > { %2287 = vsyncadd (%p2382_p3), [#allocation3], 4294959104  ;;  %s2461_s6 = sand.u32 1, %s2302_s10   ;;  %p2641_p2 = scmp.ne.s32.totalorder %s2635_s19, 0 }
  0x3f   : > { %s1707_s15 = sshll.u32 %s2461_s6, 9  ;;  %s176_s16 = scalar_lea.sflag [#allocation6], %s2461_s6 }
  0x40   : > { %s2465_s26 = scalar_lea.vmem [#allocation5], %s1707_s15 }
  0x41   : > { %2289 = dma.done.wait (%p2641_p2), %s176_s16, 8192  }
  0x42   : > { %2291 = vsyncadd (%p2641_p2), %s176_s16, 4294959104  ;;  %v1988_v0 = vld [vmem:[%s2465_s26 + $0x74] ss:$8 sps:$4 sm:$0xff]   ;;  %v1992_v2 = vld [vmem:[%s2465_s26 + $0x70] ss:$8 sps:$4 sm:$0xff]   ;;  %s1708_s17 = sshll.u32 %s2461_s6, 8 }
  0x43   : > { %v1990_v1 = vld [vmem:[%s2465_s26 + $0x174] ss:$8 sps:$4 sm:$0xff]   ;;  %972 = vmatprep.subr.bf16.mxu0 %v1988_v0  ;;  %v1993_v3 = vld [vmem:[%s2465_s26 + $0x170] ss:$8 sps:$4 sm:$0xff]   ;;  %v1994_v4 = vld [vmem:[%s2465_s26 + $0x64] ss:$8 sps:$4 sm:$0xff]  }
  0x44   : > { %1165 = vmatprep.subr.bf16.mxu1 %v1990_v1  ;;  %973 = vmatpush1.bf16.msra.mxu0 %v1992_v2  ;;  %v1996_v5 = vld [vmem:[%s2465_s26 + $0x164] ss:$8 sps:$4 sm:$0xff]   ;;  %v1998_v6 = vld [vmem:[%s2465_s26 + $0x60] ss:$8 sps:$4 sm:$0xff]   ;;  %v2000_v8 = vld [vmem:[%s2465_s26 + $0x54] ss:$8 sps:$4 sm:$0xff]  }
  0x45   : > { %1166 = vmatpush1.bf16.msra.mxu1 %v1993_v3  ;;  %974 = vmatprep.subr.bf16.mxu0 %v1994_v4  ;;  %v1999_v7 = vld [vmem:[%s2465_s26 + $0x160] ss:$8 sps:$4 sm:$0xff]   ;;  %v2002_v9 = vld [vmem:[%s2465_s26 + $0x154] ss:$8 sps:$4 sm:$0xff]   ;;  %v2004_v10 = vld [vmem:[%s2465_s26 + $0x50] ss:$8 sps:$4 sm:$0xff]  }
  0x46   : > { %1167 = vmatprep.subr.bf16.mxu1 %v1996_v5  ;;  %v2005_v11 = vld [vmem:[%s2465_s26 + $0x150] ss:$8 sps:$4 sm:$0xff]   ;;  %v2006_v12 = vld [vmem:[%s2465_s26 + $0x44] ss:$8 sps:$4 sm:$0xff]   ;;  %v2010_v14 = vld [vmem:[%s2465_s26 + $0x40] ss:$8 sps:$4 sm:$0xff]  }
  0x47   : > { %v2008_v13 = vld [vmem:[%s2465_s26 + $0x144] ss:$8 sps:$4 sm:$0xff]   ;;  %v2011_v15 = vld [vmem:[%s2465_s26 + $0x140] ss:$8 sps:$4 sm:$0xff]   ;;  %v2012_v16 = vld [vmem:[%s2465_s26 + $0x34] ss:$8 sps:$4 sm:$0xff]  }
  0x48   : > { %975 = vmatpush1.bf16.msra.mxu0 %v1998_v6  ;;  %v2014_v17 = vld [vmem:[%s2465_s26 + $0x134] ss:$8 sps:$4 sm:$0xff]   ;;  %v2016_v18 = vld [vmem:[%s2465_s26 + $0x30] ss:$8 sps:$4 sm:$0xff]   ;;  %v2018_v20 = vld [vmem:[%s2465_s26 + $0x24] ss:$8 sps:$4 sm:$0xff]  }
  0x49   : > { %1168 = vmatpush1.bf16.msra.mxu1 %v1999_v7  ;;  %976 = vmatprep.subr.bf16.mxu0 %v2000_v8  ;;  %v2017_v19 = vld [vmem:[%s2465_s26 + $0x130] ss:$8 sps:$4 sm:$0xff]   ;;  %v2020_v21 = vld [vmem:[%s2465_s26 + $0x124] ss:$8 sps:$4 sm:$0xff]   ;;  %v2022_v22 = vld [vmem:[%s2465_s26 + $0x20] ss:$8 sps:$4 sm:$0xff]  }
  0x4a   : > { %1169 = vmatprep.subr.bf16.mxu1 %v2002_v9  ;;  %v2023_v23 = vld [vmem:[%s2465_s26 + $0x120] ss:$8 sps:$4 sm:$0xff]   ;;  %v2024_v24 = vld [vmem:[%s2465_s26 + $0x14] ss:$8 sps:$4 sm:$0xff]   ;;  %v2028_v26 = vld [vmem:[%s2465_s26 + $0x10] ss:$8 sps:$4 sm:$0xff]  }
  0x4b   : > { %v2026_v25 = vld [vmem:[%s2465_s26 + $0x114] ss:$8 sps:$4 sm:$0xff]   ;;  %v2029_v27 = vld [vmem:[%s2465_s26 + $0x110] ss:$8 sps:$4 sm:$0xff]   ;;  %v2030_v28 = vld [vmem:[%s2465_s26 + $0x4] ss:$8 sps:$4 sm:$0xff]  }
  0x4c   : > { %977 = vmatpush1.bf16.msra.mxu0 %v2004_v10  ;;  %v2032_v29 = vld [vmem:[%s2465_s26 + $0x104] ss:$8 sps:$4 sm:$0xff]   ;;  %v2034_v30 = vld [vmem:[%s2465_s26] ss:$8 sps:$4 sm:$0xff]   ;;  %v2036_v32 = vld [vmem:[%s2465_s26 + $0xf4] ss:$8 sps:$4 sm:$0xff]  }
  0x4d   : > { %1170 = vmatpush1.bf16.msra.mxu1 %v2005_v11  ;;  %978 = vmatprep.subr.bf16.mxu0 %v2006_v12  ;;  %v2035_v31 = vld [vmem:[%s2465_s26 + $0x100] ss:$8 sps:$4 sm:$0xff]   ;;  %v2038_v33 = vld [vmem:[%s2465_s26 + $0x1f4] ss:$8 sps:$4 sm:$0xff]   ;;  %v2040_v34 = vld [vmem:[%s2465_s26 + $0xf0] ss:$8 sps:$4 sm:$0xff]  }
  0x4e   : > { %1171 = vmatprep.subr.bf16.mxu1 %v2008_v13  ;;  %v2041_v35 = vld [vmem:[%s2465_s26 + $0x1f0] ss:$8 sps:$4 sm:$0xff]   ;;  %v2042_v36 = vld [vmem:[%s2465_s26 + $0xe4] ss:$8 sps:$4 sm:$0xff]   ;;  %v2046_v38 = vld [vmem:[%s2465_s26 + $0xe0] ss:$8 sps:$4 sm:$0xff]  }
  0x4f   : > { %v2044_v37 = vld [vmem:[%s2465_s26 + $0x1e4] ss:$8 sps:$4 sm:$0xff]   ;;  %v2047_v39 = vld [vmem:[%s2465_s26 + $0x1e0] ss:$8 sps:$4 sm:$0xff]   ;;  %v2048_v40 = vld [vmem:[%s2465_s26 + $0xd4] ss:$8 sps:$4 sm:$0xff]  }
  0x50   : > { %979 = vmatpush1.bf16.msra.mxu0 %v2010_v14  ;;  %v2050_v41 = vld [vmem:[%s2465_s26 + $0x1d4] ss:$8 sps:$4 sm:$0xff]   ;;  %v2052_v42 = vld [vmem:[%s2465_s26 + $0xd0] ss:$8 sps:$4 sm:$0xff]   ;;  %v2054_v44 = vld [vmem:[%s2465_s26 + $0xc4] ss:$8 sps:$4 sm:$0xff]  }
  0x51   : > { %1172 = vmatpush1.bf16.msra.mxu1 %v2011_v15  ;;  %980 = vmatprep.subr.bf16.mxu0 %v2012_v16  ;;  %v2053_v43 = vld [vmem:[%s2465_s26 + $0x1d0] ss:$8 sps:$4 sm:$0xff]   ;;  %v2056_v45 = vld [vmem:[%s2465_s26 + $0x1c4] ss:$8 sps:$4 sm:$0xff]   ;;  %v2058_v46 = vld [vmem:[%s2465_s26 + $0xc0] ss:$8 sps:$4 sm:$0xff]  }
  0x52   : > { %1173 = vmatprep.subr.bf16.mxu1 %v2014_v17  ;;  %v2059_v47 = vld [vmem:[%s2465_s26 + $0x1c0] ss:$8 sps:$4 sm:$0xff]   ;;  %v2060_v48 = vld [vmem:[%s2465_s26 + $0xb4] ss:$8 sps:$4 sm:$0xff]   ;;  %v2064_v52 = vld [vmem:[%s2465_s26 + $0xb0] ss:$8 sps:$4 sm:$0xff]  }
  0x53   : > { %v2086_v49 = vld [vmem:[#allocation2 + $0x4] ss:$16 sps:$4 sm:$0xff]   ;;  %v2089_v51 = vld [vmem:[#allocation2 + $0xc] ss:$16 sps:$4 sm:$0xff]   ;;  %v2065_v53 = vld [vmem:[%s2465_s26 + $0x1b0] ss:$8 sps:$4 sm:$0xff]  }
  0x54   : > { %981 = vmatpush1.bf16.msra.mxu0 %v2016_v18  ;;  %v2062_v50 = vld [vmem:[%s2465_s26 + $0x1b4] ss:$8 sps:$4 sm:$0xff]   ;;  %1004 = vmatprep.mubr.bf16.mxu0 %v2086_v49  ;;  %v2066_v54 = vld [vmem:[%s2465_s26 + $0xa4] ss:$8 sps:$4 sm:$0xff]   ;;  %v2070_v56 = vld [vmem:[%s2465_s26 + $0xa0] ss:$8 sps:$4 sm:$0xff]  }
  0x55   : > { %1174 = vmatpush1.bf16.msra.mxu1 %v2017_v19  ;;  %982 = vmatprep.subr.bf16.mxu0 %v2018_v20  ;;  %v2068_v55 = vld [vmem:[%s2465_s26 + $0x1a4] ss:$8 sps:$4 sm:$0xff]   ;;  %v2071_v57 = vld [vmem:[%s2465_s26 + $0x1a0] ss:$8 sps:$4 sm:$0xff]   ;;  %v2072_v58 = vld [vmem:[%s2465_s26 + $0x94] ss:$8 sps:$4 sm:$0xff]  }
  0x56   : > { %1175 = vmatprep.subr.bf16.mxu1 %v2020_v21  ;;  %1197 = vmatprep.mubr.bf16.mxu1 %v2089_v51  ;;  %v2074_v59 = vld [vmem:[%s2465_s26 + $0x194] ss:$8 sps:$4 sm:$0xff]   ;;  %v2076_v60 = vld [vmem:[%s2465_s26 + $0x90] ss:$8 sps:$4 sm:$0xff]   ;;  %v2078_v62 = vld [vmem:[%s2465_s26 + $0x84] ss:$8 sps:$4 sm:$0xff]  }
  0x57   : > { %v2077_v61 = vld [vmem:[%s2465_s26 + $0x190] ss:$8 sps:$4 sm:$0xff]   ;;  %v2080_v63 = vld [vmem:[%s2465_s26 + $0x184] ss:$8 sps:$4 sm:$0xff]   ;;  %v2082_v0 = vld [vmem:[%s2465_s26 + $0x80] ss:$8 sps:$4 sm:$0xff]  }
  0x58   : > { %983 = vmatpush1.bf16.msra.mxu0 %v2022_v22  ;;  %v2083_v1 = vld [vmem:[%s2465_s26 + $0x180] ss:$8 sps:$4 sm:$0xff]   ;;  %v2090_v4 = vld [vmem:[#allocation2 + $0x24] ss:$16 sps:$4 sm:$0xff]   ;;  %v2092_v5 = vld [vmem:[#allocation2 + $0x2c] ss:$16 sps:$4 sm:$0xff]  }
  0x59   : > { %1176 = vmatpush1.bf16.msra.mxu1 %v2023_v23  ;;  %984 = vmatprep.subr.bf16.mxu0 %v2024_v24  ;;  %v2084_v2 = vld [vmem:[#allocation2] ss:$16 sps:$4 sm:$0xff]   ;;  %v2087_v3 = vld [vmem:[#allocation2 + $0x8] ss:$16 sps:$4 sm:$0xff]   ;;  %v2096_v8 = vld [vmem:[#allocation2 + $0x44] ss:$16 sps:$4 sm:$0xff]  }
  0x5a   : > { %1177 = vmatprep.subr.bf16.mxu1 %v2026_v25  ;;  %v2094_v6 = vld [vmem:[#allocation2 + $0x20] ss:$16 sps:$4 sm:$0xff]   ;;  %v2095_v7 = vld [vmem:[#allocation2 + $0x28] ss:$16 sps:$4 sm:$0xff]   ;;  %v2098_v9 = vld [vmem:[#allocation2 + $0x4c] ss:$16 sps:$4 sm:$0xff]  }
  0x5b   : > { %v2100_v10 = vld [vmem:[#allocation2 + $0x40] ss:$16 sps:$4 sm:$0xff]   ;;  %v2101_v11 = vld [vmem:[#allocation2 + $0x48] ss:$16 sps:$4 sm:$0xff]   ;;  %v2102_v12 = vld [vmem:[#allocation2 + $0x64] ss:$16 sps:$4 sm:$0xff]  }
  0x5c   : > { %985 = vmatpush1.bf16.msra.mxu0 %v2028_v26  ;;  %v2104_v13 = vld [vmem:[#allocation2 + $0x6c] ss:$16 sps:$4 sm:$0xff]   ;;  %v2106_v14 = vld [vmem:[#allocation2 + $0x60] ss:$16 sps:$4 sm:$0xff]   ;;  %v2107_v15 = vld [vmem:[#allocation2 + $0x68] ss:$16 sps:$4 sm:$0xff]  }
  0x5d   : > { %1178 = vmatpush1.bf16.msra.mxu1 %v2029_v27  ;;  %986 = vmatprep.subr.bf16.mxu0 %v2030_v28  ;;  %v2108_v16 = vld [vmem:[#allocation2 + $0x84] ss:$16 sps:$4 sm:$0xff]   ;;  %v2110_v17 = vld [vmem:[#allocation2 + $0x8c] ss:$16 sps:$4 sm:$0xff]   ;;  %v2112_v18 = vld [vmem:[#allocation2 + $0x80] ss:$16 sps:$4 sm:$0xff]  }
  0x5e   : > { %1179 = vmatprep.subr.bf16.mxu1 %v2032_v29  ;;  %v2113_v19 = vld [vmem:[#allocation2 + $0x88] ss:$16 sps:$4 sm:$0xff]   ;;  %v2114_v20 = vld [vmem:[#allocation2 + $0xa4] ss:$16 sps:$4 sm:$0xff]   ;;  %v2116_v21 = vld [vmem:[#allocation2 + $0xac] ss:$16 sps:$4 sm:$0xff]  }
  0x5f   : > { %v2118_v22 = vld [vmem:[#allocation2 + $0xa0] ss:$16 sps:$4 sm:$0xff]   ;;  %v2119_v23 = vld [vmem:[#allocation2 + $0xa8] ss:$16 sps:$4 sm:$0xff]   ;;  %v2120_v24 = vld [vmem:[#allocation2 + $0xc4] ss:$16 sps:$4 sm:$0xff]  }
  0x60   : > { %987 = vmatpush1.bf16.msra.mxu0 %v2034_v30  ;;  %v2122_v25 = vld [vmem:[#allocation2 + $0xcc] ss:$16 sps:$4 sm:$0xff]   ;;  %v2124_v26 = vld [vmem:[#allocation2 + $0xc0] ss:$16 sps:$4 sm:$0xff]   ;;  %v2125_v27 = vld [vmem:[#allocation2 + $0xc8] ss:$16 sps:$4 sm:$0xff]  }
  0x61   : > { %1180 = vmatpush1.bf16.msra.mxu1 %v2035_v31  ;;  %988 = vmatprep.subr.bf16.mxu0 %v2036_v32  ;;  %v2126_v28 = vld [vmem:[#allocation2 + $0xe4] ss:$16 sps:$4 sm:$0xff]   ;;  %v2128_v29 = vld [vmem:[#allocation2 + $0xec] ss:$16 sps:$4 sm:$0xff]   ;;  %v2130_v30 = vld [vmem:[#allocation2 + $0xe0] ss:$16 sps:$4 sm:$0xff]  }
  0x62   : > { %1181 = vmatprep.subr.bf16.mxu1 %v2038_v33  ;;  %v2131_v31 = vld [vmem:[#allocation2 + $0xe8] ss:$16 sps:$4 sm:$0xff]   ;;  %v2132_v32 = vld [vmem:[#allocation2 + $0x104] ss:$16 sps:$4 sm:$0xff]   ;;  %v2134_v33 = vld [vmem:[#allocation2 + $0x10c] ss:$16 sps:$4 sm:$0xff]  }
  0x63   : > { %v2158_v49 = vld [vmem:[#allocation2 + $0x18c] ss:$16 sps:$4 sm:$0xff]   ;;  %v2161_v51 = vld [vmem:[#allocation2 + $0x188] ss:$16 sps:$4 sm:$0xff]   ;;  %s2536_s19 = scalar_lea.vmem [#allocation7], %s1708_s17  ;;  %s1907_s22 = sshll.u32 %s2310_s12, 7 }
  0x64   : > { %989 = vmatpush2.bf16.msra.mxu0 %v2040_v34  ;;  %v2136_v34 = vld [vmem:[#allocation2 + $0x100] ss:$16 sps:$4 sm:$0xff]   ;;  %s1599_s29 = sshll.u32 %s2536_s19, 4  ;;  %s2574_s25 = scalar_lea.hbm %s2627_s2, %s1907_s22  ;;  %s2576_s29 = int_to_ptr.vmem [resolvable:$true] %s1599_s29 }
  0x65   : > { %1182 = vmatpush2.bf16.msra.mxu1 %v2041_v35  ;;  %990 = vmatprep.subr.bf16.mxu0 %v2042_v36  ;;  %v2137_v35 = vld [vmem:[#allocation2 + $0x108] ss:$16 sps:$4 sm:$0xff]   ;;  %v2138_v36 = vld [vmem:[#allocation2 + $0x124] ss:$16 sps:$4 sm:$0xff]   ;;  %s1583_s12 = scalar_lea.sflag [#allocation4], %s2461_s6  ;;  %s2234_s28 = scalar_lea.vmem %s2576_s29, 4096 }
  0x66   : > { %1183 = vmatprep.subr.bf16.mxu1 %v2044_v37  ;;  %v2140_v37 = vld [vmem:[#allocation2 + $0x12c] ss:$16 sps:$4 sm:$0xff]   ;;  %p2235_p3 = scmp.ne.s32.totalorder %s2576_s29, %s2234_s28  ;;  %p2642_p12 = scmp.ne.s32.totalorder %s2636_s20, 0 }
  0x67   : > { %s2326_s24 = smov [#allocation7]  }
  0x68   : > { %991 = vmatpush2.bf16.msra.mxu0 %v2046_v38  ;;  %v2142_v38 = vld [vmem:[#allocation2 + $0x120] ss:$16 sps:$4 sm:$0xff]   ;;  %p2236_p13 = pnand %p2235_p3, %p2642_p12  ;;  %s2238_s30 = sshll.u32 %s2326_s24, 4  ;;  %s2239_s30 = int_to_ptr.vmem [resolvable:$false] %s2238_s30 }
  0x69   : > { %1184 = vmatpush2.bf16.msra.mxu1 %v2047_v39  ;;  %992 = vmatprep.subr.bf16.mxu0 %v2048_v40  ;;  %v2143_v39 = vld [vmem:[#allocation2 + $0x128] ss:$16 sps:$4 sm:$0xff]   ;;  %v2144_v40 = vld [vmem:[#allocation2 + $0x144] ss:$16 sps:$4 sm:$0xff]   ;;  %s2240_s3 = scalar_lea.vmem %s2239_s30, 8192  ;;  %p2241_p6 = scmp.lt.s32.totalorder %s2576_s29, %s2239_s30 }
  0x6a   : > { %1185 = vmatprep.subr.bf16.mxu1 %v2050_v41  ;;  %v2146_v41 = vld [vmem:[#allocation2 + $0x14c] ss:$16 sps:$4 sm:$0xff]   ;;  %p2237_p4 = pneg %p2236_p13  ;;  %p2242_p8 = scmp.lt.s32.totalorder %s2240_s3, %s2234_s28 }
  0x6c   : > { %993 = vmatpush2.bf16.msra.mxu0 %v2052_v42  ;;  %v2148_v42 = vld [vmem:[#allocation2 + $0x140] ss:$16 sps:$4 sm:$0xff]   ;;  %p2243_p10 = por %p2242_p8, %p2241_p6 }
  0x6d   : > { %1186 = vmatpush2.bf16.msra.mxu1 %v2053_v43  ;;  %994 = vmatprep.subr.bf16.mxu0 %v2054_v44  ;;  %v2149_v43 = vld [vmem:[#allocation2 + $0x148] ss:$16 sps:$4 sm:$0xff]   ;;  %v2150_v44 = vld [vmem:[#allocation2 + $0x164] ss:$16 sps:$4 sm:$0xff]  }
  0x6e   : > { %1187 = vmatprep.subr.bf16.mxu1 %v2056_v45  ;;  %v2152_v45 = vld [vmem:[#allocation2 + $0x16c] ss:$16 sps:$4 sm:$0xff]   ;;  %p2244_p0 = pnand %p2243_p10, %p2237_p4 }
  0x70   : > { %995 = vmatpush2.bf16.msra.mxu0 %v2058_v46  ;;  %v2154_v46 = vld [vmem:[#allocation2 + $0x160] ss:$16 sps:$4 sm:$0xff]  }
  0x71   : > { %1188 = vmatpush2.bf16.msra.mxu1 %v2059_v47  ;;  %996 = vmatprep.subr.bf16.mxu0 %v2060_v48  ;;  %v2155_v47 = vld [vmem:[#allocation2 + $0x168] ss:$16 sps:$4 sm:$0xff]   ;;  %v2156_v48 = vld [vmem:[#allocation2 + $0x184] ss:$16 sps:$4 sm:$0xff]  }
  0x72   : > { %1189 = vmatprep.subr.bf16.mxu1 %v2062_v50  ;;  %v2160_v50 = vld [vmem:[#allocation2 + $0x180] ss:$16 sps:$4 sm:$0xff]  }
  0x74   : > { %997 = vmatpush2.bf16.msra.mxu0 %v2064_v52  ;;  %v2162_v52 = vld [vmem:[#allocation2 + $0x1a4] ss:$16 sps:$4 sm:$0xff]  }
  0x75   : > { %1190 = vmatpush2.bf16.msra.mxu1 %v2065_v53  ;;  %998 = vmatprep.subr.bf16.mxu0 %v2066_v54  ;;  %v2164_v53 = vld [vmem:[#allocation2 + $0x1ac] ss:$16 sps:$4 sm:$0xff]   ;;  %v2166_v54 = vld [vmem:[#allocation2 + $0x1a0] ss:$16 sps:$4 sm:$0xff]  }
  0x76   : > { %1191 = vmatprep.subr.bf16.mxu1 %v2068_v55  ;;  %v2167_v55 = vld [vmem:[#allocation2 + $0x1a8] ss:$16 sps:$4 sm:$0xff]  }
  0x78   : > { %999 = vmatpush2.bf16.msra.mxu0 %v2070_v56  ;;  %v2168_v56 = vld [vmem:[#allocation2 + $0x1c4] ss:$16 sps:$4 sm:$0xff]  }
  0x79   : > { %1192 = vmatpush2.bf16.msra.mxu1 %v2071_v57  ;;  %1000 = vmatprep.subr.bf16.mxu0 %v2072_v58  ;;  %v2170_v57 = vld [vmem:[#allocation2 + $0x1cc] ss:$16 sps:$4 sm:$0xff]   ;;  %v2172_v58 = vld [vmem:[#allocation2 + $0x1c0] ss:$16 sps:$4 sm:$0xff]  }
  0x7a   : > { %1193 = vmatprep.subr.bf16.mxu1 %v2074_v59  ;;  %v2173_v59 = vld [vmem:[#allocation2 + $0x1c8] ss:$16 sps:$4 sm:$0xff]  }
  0x7c   : > { %1001 = vmatpush2.bf16.msra.mxu0 %v2076_v60  ;;  %v2174_v60 = vld [vmem:[#allocation2 + $0x1e4] ss:$16 sps:$4 sm:$0xff]  }
  0x7d   : > { %1194 = vmatpush2.bf16.msra.mxu1 %v2077_v61  ;;  %1002 = vmatprep.subr.bf16.mxu0 %v2078_v62  ;;  %v2176_v61 = vld [vmem:[#allocation2 + $0x1ec] ss:$16 sps:$4 sm:$0xff]   ;;  %v2178_v62 = vld [vmem:[#allocation2 + $0x1e0] ss:$16 sps:$4 sm:$0xff]  }
  0x7e   : > { %1195 = vmatprep.subr.bf16.mxu1 %v2080_v63  ;;  %v2179_v63 = vld [vmem:[#allocation2 + $0x1e8] ss:$16 sps:$4 sm:$0xff]  }
  0x80   : > { %1003 = vmatpush2.bf16.msra.mxu0 %v2082_v0 }
  0x81   : > { %1196 = vmatpush2.bf16.msra.mxu1 %v2083_v1 }
  0x83   : > { %1005 = vmatmul.mubr.bf16.vlgmr.msra.gmra.mxu0 %v2084_v2 }
  0x84   : > { %1198 = vmatmul.mubr.bf16.vlgmr.msra.gmra.mxu1 %v2087_v3  ;;  %1014 = vmatprep.mubr.bf16.mxu0 %v2090_v4 }
  0x85   : > { %1207 = vmatprep.mubr.bf16.mxu1 %v2092_v5 }
  0x8b   : > { %1015 = vmatmul.mubr.bf16.gmra.mxu0 %v2094_v6 }
  0x8c   : > { %1208 = vmatmul.mubr.bf16.gmra.mxu1 %v2095_v7  ;;  %1024 = vmatprep.mubr.bf16.mxu0 %v2096_v8 }
  0x8d   : > { %1217 = vmatprep.mubr.bf16.mxu1 %v2098_v9 }
  0x93   : > { %1025 = vmatmul.mubr.bf16.gmra.mxu0 %v2100_v10 }
  0x94   : > { %1218 = vmatmul.mubr.bf16.gmra.mxu1 %v2101_v11  ;;  %1034 = vmatprep.mubr.bf16.mxu0 %v2102_v12 }
  0x95   : > { %1227 = vmatprep.mubr.bf16.mxu1 %v2104_v13 }
  0x9b   : > { %1035 = vmatmul.mubr.bf16.gmra.mxu0 %v2106_v14 }
  0x9c   : > { %1228 = vmatmul.mubr.bf16.gmra.mxu1 %v2107_v15  ;;  %1044 = vmatprep.mubr.bf16.mxu0 %v2108_v16 }
  0x9d   : > { %1237 = vmatprep.mubr.bf16.mxu1 %v2110_v17 }
  0xa3   : > { %1045 = vmatmul.mubr.bf16.gmra.mxu0 %v2112_v18 }
  0xa4   : > { %1238 = vmatmul.mubr.bf16.gmra.mxu1 %v2113_v19  ;;  %1054 = vmatprep.mubr.bf16.mxu0 %v2114_v20 }
  0xa5   : > { %1247 = vmatprep.mubr.bf16.mxu1 %v2116_v21 }
  0xab   : > { %1055 = vmatmul.mubr.bf16.gmra.mxu0 %v2118_v22 }
  0xac   : > { %1248 = vmatmul.mubr.bf16.gmra.mxu1 %v2119_v23  ;;  %1064 = vmatprep.mubr.bf16.mxu0 %v2120_v24 }
  0xad   : > { %1257 = vmatprep.mubr.bf16.mxu1 %v2122_v25 }
  0xb3   : > { %1065 = vmatmul.mubr.bf16.gmra.mxu0 %v2124_v26 }
  0xb4   : > { %1258 = vmatmul.mubr.bf16.gmra.mxu1 %v2125_v27  ;;  %1074 = vmatprep.mubr.bf16.mxu0 %v2126_v28 }
  0xb5   : > { %1267 = vmatprep.mubr.bf16.mxu1 %v2128_v29 }
  0xbb   : > { %1075 = vmatmul.mubr.bf16.gmra.mxu0 %v2130_v30 }
  0xbc   : > { %1268 = vmatmul.mubr.bf16.gmra.mxu1 %v2131_v31  ;;  %1084 = vmatprep.mubr.bf16.mxu0 %v2132_v32 }
  0xbd   : > { %1277 = vmatprep.mubr.bf16.mxu1 %v2134_v33 }
  0xc3   : > { %1085 = vmatmul.mubr.bf16.gmra.mxu0 %v2136_v34 }
  0xc4   : > { %1278 = vmatmul.mubr.bf16.gmra.mxu1 %v2137_v35  ;;  %1094 = vmatprep.mubr.bf16.mxu0 %v2138_v36 }
  0xc5   : > { %1287 = vmatprep.mubr.bf16.mxu1 %v2140_v37 }
  0xcb   : > { %1095 = vmatmul.mubr.bf16.gmra.mxu0 %v2142_v38 }
  0xcc   : > { %1288 = vmatmul.mubr.bf16.gmra.mxu1 %v2143_v39  ;;  %1104 = vmatprep.mubr.bf16.mxu0 %v2144_v40 }
  0xcd   : > { %1297 = vmatprep.mubr.bf16.mxu1 %v2146_v41 }
  0xd3   : > { %1105 = vmatmul.mubr.bf16.gmra.mxu0 %v2148_v42 }
  0xd4   : > { %1298 = vmatmul.mubr.bf16.gmra.mxu1 %v2149_v43  ;;  %1114 = vmatprep.mubr.bf16.mxu0 %v2150_v44 }
  0xd5   : > { %1307 = vmatprep.mubr.bf16.mxu1 %v2152_v45 }
  0xdb   : > { %1115 = vmatmul.mubr.bf16.gmra.mxu0 %v2154_v46 }
  0xdc   : > { %1308 = vmatmul.mubr.bf16.gmra.mxu1 %v2155_v47  ;;  %1124 = vmatprep.mubr.bf16.mxu0 %v2156_v48 }
  0xdd   : > { %1317 = vmatprep.mubr.bf16.mxu1 %v2158_v49 }
  0xe3   : > { %1125 = vmatmul.mubr.bf16.gmra.mxu0 %v2160_v50 }
  0xe4   : > { %1318 = vmatmul.mubr.bf16.gmra.mxu1 %v2161_v51  ;;  %1134 = vmatprep.mubr.bf16.mxu0 %v2162_v52 }
  0xe5   : > { %1327 = vmatprep.mubr.bf16.mxu1 %v2164_v53 }
  0xeb   : > { %1135 = vmatmul.mubr.bf16.gmra.mxu0 %v2166_v54 }
  0xec   : > { %1328 = vmatmul.mubr.bf16.gmra.mxu1 %v2167_v55  ;;  %1144 = vmatprep.mubr.bf16.mxu0 %v2168_v56 }
  0xed   : > { %1337 = vmatprep.mubr.bf16.mxu1 %v2170_v57 }
  0xf3   : > { %1145 = vmatmul.mubr.bf16.gmra.mxu0 %v2172_v58 }
  0xf4   : > { %1338 = vmatmul.mubr.bf16.gmra.mxu1 %v2173_v59  ;;  %1154 = vmatprep.mubr.bf16.mxu0 %v2174_v60 }
  0xf5   : > { %1347 = vmatprep.mubr.bf16.mxu1 %v2176_v61 }
  0xfb   : > { %1155 = vmatmul.mubr.bf16.gmra.mxu0 %v2178_v62 }
  0xfc   : > { %1348 = vmatmul.mubr.bf16.gmra.mxu1 %v2179_v63 }
 0x143   : > { %v1006_v0 = vpop.f32.mrf.mxu0 }
 0x144   : > { %v1199_v1 = vpop.f32.mrf.mxu1 }
 0x145   : > { %v1008_v2 = vpop.f32.mrf.mxu0  ;;  %v1200_v4 = vadd.f32 %v1199_v1, %v1006_v0 }
 0x146   : > { %v1201_v3 = vpop.f32.mrf.mxu1 }
 0x147   : > { %v1202_v5 = vadd.f32 %v1201_v3, %v1008_v2  ;;  %v1010_v6 = vpop.f32.mrf.mxu0 }
 0x148   : > { %v1203_v7 = vpop.f32.mrf.mxu1 }
 0x149   : > { %v1875_v8 = vpack.c.bf16 %v1202_v5, %v1200_v4  ;;  %v1012_v9 = vpop.f32.mrf.mxu0  ;;  %v1204_v11 = vadd.f32 %v1203_v7, %v1010_v6 }
 0x14a   : > { %v1205_v10 = vpop.f32.mrf.mxu1 }
 0x14b   : > { %1550 = vst [vmem:[%s2536_s19] sm:$0xff] %v1875_v8  ;;  %v1206_v12 = vadd.f32 %v1205_v10, %v1012_v9  ;;  %v1016_v13 = vpop.f32.mrf.mxu0 }
 0x14c   : > { %v1209_v14 = vpop.f32.mrf.mxu1 }
 0x14d   : > { %v1876_v15 = vpack.c.bf16 %v1206_v12, %v1204_v11  ;;  %v1018_v16 = vpop.f32.mrf.mxu0  ;;  %v1210_v18 = vadd.f32 %v1209_v14, %v1016_v13 }
 0x14e   : > { %v1211_v17 = vpop.f32.mrf.mxu1 }
 0x14f   : > { %1551 = vst [vmem:[%s2536_s19 + $0x8] sm:$0xff] %v1876_v15  ;;  %v1212_v19 = vadd.f32 %v1211_v17, %v1018_v16  ;;  %v1020_v20 = vpop.f32.mrf.mxu0 }
 0x150   : > { %v1213_v21 = vpop.f32.mrf.mxu1 }
 0x151   : > { %v1877_v22 = vpack.c.bf16 %v1212_v19, %v1210_v18  ;;  %v1022_v23 = vpop.f32.mrf.mxu0  ;;  %v1214_v25 = vadd.f32 %v1213_v21, %v1020_v20 }
 0x152   : > { %v1215_v24 = vpop.f32.mrf.mxu1 }
 0x153   : > { %1552 = vst [vmem:[%s2536_s19 + $0x10] sm:$0xff] %v1877_v22  ;;  %v1216_v26 = vadd.f32 %v1215_v24, %v1022_v23  ;;  %v1026_v27 = vpop.f32.mrf.mxu0 }
 0x154   : > { %v1219_v28 = vpop.f32.mrf.mxu1 }
 0x155   : > { %v1878_v29 = vpack.c.bf16 %v1216_v26, %v1214_v25  ;;  %v1028_v30 = vpop.f32.mrf.mxu0  ;;  %v1220_v32 = vadd.f32 %v1219_v28, %v1026_v27 }
 0x156   : > { %v1221_v31 = vpop.f32.mrf.mxu1 }
 0x157   : > { %1553 = vst [vmem:[%s2536_s19 + $0x18] sm:$0xff] %v1878_v29  ;;  %v1222_v33 = vadd.f32 %v1221_v31, %v1028_v30  ;;  %v1030_v34 = vpop.f32.mrf.mxu0 }
 0x158   : > { %v1223_v35 = vpop.f32.mrf.mxu1 }
 0x159   : > { %v1879_v36 = vpack.c.bf16 %v1222_v33, %v1220_v32  ;;  %v1032_v37 = vpop.f32.mrf.mxu0  ;;  %v1224_v39 = vadd.f32 %v1223_v35, %v1030_v34 }
 0x15a   : > { %v1225_v38 = vpop.f32.mrf.mxu1 }
 0x15b   : > { %1554 = vst [vmem:[%s2536_s19 + $0x20] sm:$0xff] %v1879_v36  ;;  %v1226_v40 = vadd.f32 %v1225_v38, %v1032_v37  ;;  %v1036_v41 = vpop.f32.mrf.mxu0 }
 0x15c   : > { %v1229_v42 = vpop.f32.mrf.mxu1 }
 0x15d   : > { %v1880_v43 = vpack.c.bf16 %v1226_v40, %v1224_v39  ;;  %v1038_v44 = vpop.f32.mrf.mxu0  ;;  %v1230_v46 = vadd.f32 %v1229_v42, %v1036_v41 }
 0x15e   : > { %v1231_v45 = vpop.f32.mrf.mxu1 }
 0x15f   : > { %1555 = vst [vmem:[%s2536_s19 + $0x28] sm:$0xff] %v1880_v43  ;;  %v1232_v47 = vadd.f32 %v1231_v45, %v1038_v44  ;;  %v1040_v48 = vpop.f32.mrf.mxu0 }
 0x160   : > { %v1233_v49 = vpop.f32.mrf.mxu1 }
 0x161   : > { %v1881_v50 = vpack.c.bf16 %v1232_v47, %v1230_v46  ;;  %v1042_v51 = vpop.f32.mrf.mxu0  ;;  %v1234_v53 = vadd.f32 %v1233_v49, %v1040_v48 }
 0x162   : > { %v1235_v52 = vpop.f32.mrf.mxu1 }
 0x163   : > { %1556 = vst [vmem:[%s2536_s19 + $0x30] sm:$0xff] %v1881_v50  ;;  %v1236_v54 = vadd.f32 %v1235_v52, %v1042_v51  ;;  %v1046_v55 = vpop.f32.mrf.mxu0 }
 0x164   : > { %v1239_v56 = vpop.f32.mrf.mxu1 }
 0x165   : > { %v1882_v57 = vpack.c.bf16 %v1236_v54, %v1234_v53  ;;  %v1048_v58 = vpop.f32.mrf.mxu0  ;;  %v1240_v60 = vadd.f32 %v1239_v56, %v1046_v55 }
 0x166   : > { %v1241_v59 = vpop.f32.mrf.mxu1 }
 0x167   : > { %1557 = vst [vmem:[%s2536_s19 + $0x38] sm:$0xff] %v1882_v57  ;;  %v1242_v61 = vadd.f32 %v1241_v59, %v1048_v58  ;;  %v1050_v62 = vpop.f32.mrf.mxu0 }
 0x168   : > { %v1243_v63 = vpop.f32.mrf.mxu1 }
 0x169   : > { %v1883_v0 = vpack.c.bf16 %v1242_v61, %v1240_v60  ;;  %v1052_v1 = vpop.f32.mrf.mxu0  ;;  %v1244_v3 = vadd.f32 %v1243_v63, %v1050_v62 }
 0x16a   : > { %v1245_v2 = vpop.f32.mrf.mxu1 }
 0x16b   : > { %1558 = vst [vmem:[%s2536_s19 + $0x40] sm:$0xff] %v1883_v0  ;;  %v1246_v4 = vadd.f32 %v1245_v2, %v1052_v1  ;;  %v1056_v5 = vpop.f32.mrf.mxu0 }
 0x16c   : > { %v1249_v6 = vpop.f32.mrf.mxu1 }
 0x16d   : > { %v1884_v7 = vpack.c.bf16 %v1246_v4, %v1244_v3  ;;  %v1058_v8 = vpop.f32.mrf.mxu0  ;;  %v1250_v10 = vadd.f32 %v1249_v6, %v1056_v5 }
 0x16e   : > { %v1251_v9 = vpop.f32.mrf.mxu1 }
 0x16f   : > { %1559 = vst [vmem:[%s2536_s19 + $0x48] sm:$0xff] %v1884_v7  ;;  %v1252_v11 = vadd.f32 %v1251_v9, %v1058_v8  ;;  %v1060_v12 = vpop.f32.mrf.mxu0 }
 0x170   : > { %v1253_v13 = vpop.f32.mrf.mxu1 }
 0x171   : > { %v1885_v14 = vpack.c.bf16 %v1252_v11, %v1250_v10  ;;  %v1062_v15 = vpop.f32.mrf.mxu0  ;;  %v1254_v17 = vadd.f32 %v1253_v13, %v1060_v12 }
 0x172   : > { %v1255_v16 = vpop.f32.mrf.mxu1 }
 0x173   : > { %1560 = vst [vmem:[%s2536_s19 + $0x50] sm:$0xff] %v1885_v14  ;;  %v1256_v18 = vadd.f32 %v1255_v16, %v1062_v15  ;;  %v1066_v19 = vpop.f32.mrf.mxu0 }
 0x174   : > { %v1259_v20 = vpop.f32.mrf.mxu1 }
 0x175   : > { %v1886_v21 = vpack.c.bf16 %v1256_v18, %v1254_v17  ;;  %v1068_v22 = vpop.f32.mrf.mxu0  ;;  %v1260_v24 = vadd.f32 %v1259_v20, %v1066_v19 }
 0x176   : > { %v1261_v23 = vpop.f32.mrf.mxu1 }
 0x177   : > { %1561 = vst [vmem:[%s2536_s19 + $0x58] sm:$0xff] %v1886_v21  ;;  %v1262_v25 = vadd.f32 %v1261_v23, %v1068_v22  ;;  %v1070_v26 = vpop.f32.mrf.mxu0 }
 0x178   : > { %v1263_v27 = vpop.f32.mrf.mxu1 }
 0x179   : > { %v1887_v28 = vpack.c.bf16 %v1262_v25, %v1260_v24  ;;  %v1072_v29 = vpop.f32.mrf.mxu0  ;;  %v1264_v31 = vadd.f32 %v1263_v27, %v1070_v26 }
 0x17a   : > { %v1265_v30 = vpop.f32.mrf.mxu1 }
 0x17b   : > { %1562 = vst [vmem:[%s2536_s19 + $0x60] sm:$0xff] %v1887_v28  ;;  %v1266_v32 = vadd.f32 %v1265_v30, %v1072_v29  ;;  %v1076_v33 = vpop.f32.mrf.mxu0 }
 0x17c   : > { %v1269_v34 = vpop.f32.mrf.mxu1 }
 0x17d   : > { %v1888_v35 = vpack.c.bf16 %v1266_v32, %v1264_v31  ;;  %v1078_v36 = vpop.f32.mrf.mxu0  ;;  %v1270_v38 = vadd.f32 %v1269_v34, %v1076_v33 }
 0x17e   : > { %v1271_v37 = vpop.f32.mrf.mxu1 }
 0x17f   : > { %1563 = vst [vmem:[%s2536_s19 + $0x68] sm:$0xff] %v1888_v35  ;;  %v1272_v39 = vadd.f32 %v1271_v37, %v1078_v36  ;;  %v1080_v40 = vpop.f32.mrf.mxu0 }
 0x180   : > { %v1273_v41 = vpop.f32.mrf.mxu1 }
 0x181   : > { %v1889_v42 = vpack.c.bf16 %v1272_v39, %v1270_v38  ;;  %v1082_v43 = vpop.f32.mrf.mxu0  ;;  %v1274_v45 = vadd.f32 %v1273_v41, %v1080_v40 }
 0x182   : > { %v1275_v44 = vpop.f32.mrf.mxu1 }
 0x183   : > { %1564 = vst [vmem:[%s2536_s19 + $0x70] sm:$0xff] %v1889_v42  ;;  %v1276_v46 = vadd.f32 %v1275_v44, %v1082_v43  ;;  %v1086_v47 = vpop.f32.mrf.mxu0 }
 0x184   : > { %v1279_v48 = vpop.f32.mrf.mxu1 }
 0x185   : > { %v1890_v49 = vpack.c.bf16 %v1276_v46, %v1274_v45  ;;  %v1088_v50 = vpop.f32.mrf.mxu0  ;;  %v1280_v52 = vadd.f32 %v1279_v48, %v1086_v47 }
 0x186   : > { %v1281_v51 = vpop.f32.mrf.mxu1 }
 0x187   : > { %1565 = vst [vmem:[%s2536_s19 + $0x78] sm:$0xff] %v1890_v49  ;;  %v1282_v53 = vadd.f32 %v1281_v51, %v1088_v50  ;;  %v1090_v54 = vpop.f32.mrf.mxu0 }
 0x188   : > { %v1283_v55 = vpop.f32.mrf.mxu1 }
 0x189   : > { %v1891_v56 = vpack.c.bf16 %v1282_v53, %v1280_v52  ;;  %v1092_v57 = vpop.f32.mrf.mxu0  ;;  %v1284_v59 = vadd.f32 %v1283_v55, %v1090_v54 }
 0x18a   : > { %v1285_v58 = vpop.f32.mrf.mxu1 }
 0x18b   : > { %1566 = vst [vmem:[%s2536_s19 + $0x80] sm:$0xff] %v1891_v56  ;;  %v1286_v60 = vadd.f32 %v1285_v58, %v1092_v57  ;;  %v1096_v61 = vpop.f32.mrf.mxu0 }
 0x18c   : > { %v1289_v62 = vpop.f32.mrf.mxu1 }
 0x18d   : > { %v1892_v63 = vpack.c.bf16 %v1286_v60, %v1284_v59  ;;  %v1098_v0 = vpop.f32.mrf.mxu0  ;;  %v1290_v2 = vadd.f32 %v1289_v62, %v1096_v61 }
 0x18e   : > { %v1291_v1 = vpop.f32.mrf.mxu1 }
 0x18f   : > { %1567 = vst [vmem:[%s2536_s19 + $0x88] sm:$0xff] %v1892_v63  ;;  %v1292_v3 = vadd.f32 %v1291_v1, %v1098_v0  ;;  %v1100_v4 = vpop.f32.mrf.mxu0 }
 0x190   : > { %v1293_v5 = vpop.f32.mrf.mxu1 }
 0x191   : > { %v1893_v6 = vpack.c.bf16 %v1292_v3, %v1290_v2  ;;  %v1102_v7 = vpop.f32.mrf.mxu0  ;;  %v1294_v9 = vadd.f32 %v1293_v5, %v1100_v4 }
 0x192   : > { %v1295_v8 = vpop.f32.mrf.mxu1 }
 0x193   : > { %1568 = vst [vmem:[%s2536_s19 + $0x90] sm:$0xff] %v1893_v6  ;;  %v1296_v10 = vadd.f32 %v1295_v8, %v1102_v7  ;;  %v1106_v11 = vpop.f32.mrf.mxu0 }
 0x194   : > { %v1299_v12 = vpop.f32.mrf.mxu1 }
 0x195   : > { %v1894_v13 = vpack.c.bf16 %v1296_v10, %v1294_v9  ;;  %v1108_v14 = vpop.f32.mrf.mxu0  ;;  %v1300_v16 = vadd.f32 %v1299_v12, %v1106_v11 }
 0x196   : > { %v1301_v15 = vpop.f32.mrf.mxu1 }
 0x197   : > { %1569 = vst [vmem:[%s2536_s19 + $0x98] sm:$0xff] %v1894_v13  ;;  %v1302_v17 = vadd.f32 %v1301_v15, %v1108_v14  ;;  %v1110_v18 = vpop.f32.mrf.mxu0 }
 0x198   : > { %v1303_v19 = vpop.f32.mrf.mxu1 }
 0x199   : > { %v1895_v20 = vpack.c.bf16 %v1302_v17, %v1300_v16  ;;  %v1112_v21 = vpop.f32.mrf.mxu0  ;;  %v1304_v23 = vadd.f32 %v1303_v19, %v1110_v18 }
 0x19a   : > { %v1305_v22 = vpop.f32.mrf.mxu1 }
 0x19b   : > { %1570 = vst [vmem:[%s2536_s19 + $0xa0] sm:$0xff] %v1895_v20  ;;  %v1306_v24 = vadd.f32 %v1305_v22, %v1112_v21  ;;  %v1116_v25 = vpop.f32.mrf.mxu0 }
 0x19c   : > { %v1309_v26 = vpop.f32.mrf.mxu1 }
 0x19d   : > { %v1896_v27 = vpack.c.bf16 %v1306_v24, %v1304_v23  ;;  %v1118_v28 = vpop.f32.mrf.mxu0  ;;  %v1310_v30 = vadd.f32 %v1309_v26, %v1116_v25 }
 0x19e   : > { %v1311_v29 = vpop.f32.mrf.mxu1 }
 0x19f   : > { %1571 = vst [vmem:[%s2536_s19 + $0xa8] sm:$0xff] %v1896_v27  ;;  %v1312_v31 = vadd.f32 %v1311_v29, %v1118_v28  ;;  %v1120_v32 = vpop.f32.mrf.mxu0 }
 0x1a0   : > { %v1313_v33 = vpop.f32.mrf.mxu1 }
 0x1a1   : > { %v1897_v34 = vpack.c.bf16 %v1312_v31, %v1310_v30  ;;  %v1122_v35 = vpop.f32.mrf.mxu0  ;;  %v1314_v37 = vadd.f32 %v1313_v33, %v1120_v32 }
 0x1a2   : > { %v1315_v36 = vpop.f32.mrf.mxu1 }
 0x1a3   : > { %1572 = vst [vmem:[%s2536_s19 + $0xb0] sm:$0xff] %v1897_v34  ;;  %v1316_v38 = vadd.f32 %v1315_v36, %v1122_v35  ;;  %v1126_v39 = vpop.f32.mrf.mxu0 }
 0x1a4   : > { %v1319_v40 = vpop.f32.mrf.mxu1 }
 0x1a5   : > { %v1898_v41 = vpack.c.bf16 %v1316_v38, %v1314_v37  ;;  %v1128_v42 = vpop.f32.mrf.mxu0  ;;  %v1320_v44 = vadd.f32 %v1319_v40, %v1126_v39 }
 0x1a6   : > { %v1321_v43 = vpop.f32.mrf.mxu1 }
 0x1a7   : > { %1573 = vst [vmem:[%s2536_s19 + $0xb8] sm:$0xff] %v1898_v41  ;;  %v1322_v45 = vadd.f32 %v1321_v43, %v1128_v42  ;;  %v1130_v46 = vpop.f32.mrf.mxu0 }
 0x1a8   : > { %v1323_v47 = vpop.f32.mrf.mxu1 }
 0x1a9   : > { %v1899_v48 = vpack.c.bf16 %v1322_v45, %v1320_v44  ;;  %v1132_v49 = vpop.f32.mrf.mxu0  ;;  %v1324_v51 = vadd.f32 %v1323_v47, %v1130_v46 }
 0x1aa   : > { %v1325_v50 = vpop.f32.mrf.mxu1 }
 0x1ab   : > { %1574 = vst [vmem:[%s2536_s19 + $0xc0] sm:$0xff] %v1899_v48  ;;  %v1326_v52 = vadd.f32 %v1325_v50, %v1132_v49  ;;  %v1136_v53 = vpop.f32.mrf.mxu0 }
 0x1ac   : > { %v1329_v54 = vpop.f32.mrf.mxu1 }
 0x1ad   : > { %v1900_v55 = vpack.c.bf16 %v1326_v52, %v1324_v51  ;;  %v1138_v56 = vpop.f32.mrf.mxu0  ;;  %v1330_v58 = vadd.f32 %v1329_v54, %v1136_v53 }
 0x1ae   : > { %v1331_v57 = vpop.f32.mrf.mxu1 }
 0x1af   : > { %1575 = vst [vmem:[%s2536_s19 + $0xc8] sm:$0xff] %v1900_v55  ;;  %v1332_v59 = vadd.f32 %v1331_v57, %v1138_v56  ;;  %v1140_v60 = vpop.f32.mrf.mxu0 }
 0x1b0   : > { %v1333_v61 = vpop.f32.mrf.mxu1 }
 0x1b1   : > { %v1901_v62 = vpack.c.bf16 %v1332_v59, %v1330_v58  ;;  %v1142_v63 = vpop.f32.mrf.mxu0  ;;  %v1334_v1 = vadd.f32 %v1333_v61, %v1140_v60 }
 0x1b2   : > { %v1335_v0 = vpop.f32.mrf.mxu1 }
 0x1b3   : > { %1576 = vst [vmem:[%s2536_s19 + $0xd0] sm:$0xff] %v1901_v62  ;;  %v1336_v2 = vadd.f32 %v1335_v0, %v1142_v63  ;;  %v1146_v3 = vpop.f32.mrf.mxu0 }
 0x1b4   : > { %v1339_v4 = vpop.f32.mrf.mxu1 }
 0x1b5   : > { %v1902_v5 = vpack.c.bf16 %v1336_v2, %v1334_v1  ;;  %v1148_v6 = vpop.f32.mrf.mxu0  ;;  %v1340_v8 = vadd.f32 %v1339_v4, %v1146_v3 }
 0x1b6   : > { %v1341_v7 = vpop.f32.mrf.mxu1 }
 0x1b7   : > { %1577 = vst [vmem:[%s2536_s19 + $0xd8] sm:$0xff] %v1902_v5  ;;  %v1342_v9 = vadd.f32 %v1341_v7, %v1148_v6  ;;  %v1150_v10 = vpop.f32.mrf.mxu0 }
 0x1b8   : > { %v1343_v11 = vpop.f32.mrf.mxu1 }
 0x1b9   : > { %v1903_v12 = vpack.c.bf16 %v1342_v9, %v1340_v8  ;;  %v1152_v13 = vpop.f32.mrf.mxu0  ;;  %v1344_v15 = vadd.f32 %v1343_v11, %v1150_v10 }
 0x1ba   : > { %v1345_v14 = vpop.f32.mrf.mxu1 }
 0x1bb   : > { %1578 = vst [vmem:[%s2536_s19 + $0xe0] sm:$0xff] %v1903_v12  ;;  %v1346_v16 = vadd.f32 %v1345_v14, %v1152_v13  ;;  %v1156_v17 = vpop.f32.mrf.mxu0 }
 0x1bc   : > { %v1349_v18 = vpop.f32.mrf.mxu1 }
 0x1bd   : > { %v1904_v19 = vpack.c.bf16 %v1346_v16, %v1344_v15  ;;  %v1158_v20 = vpop.f32.mrf.mxu0  ;;  %v1350_v22 = vadd.f32 %v1349_v18, %v1156_v17 }
 0x1be   : > { %v1351_v21 = vpop.f32.mrf.mxu1 }
 0x1bf   : > { %1579 = vst [vmem:[%s2536_s19 + $0xe8] sm:$0xff] %v1904_v19  ;;  %v1352_v23 = vadd.f32 %v1351_v21, %v1158_v20  ;;  %v1160_v24 = vpop.f32.mrf.mxu0 }
 0x1c0   : > { %v1353_v25 = vpop.f32.mrf.mxu1 }
 0x1c1   : > { %v1905_v26 = vpack.c.bf16 %v1352_v23, %v1350_v22  ;;  %v1162_v27 = vpop.f32.mrf.mxu0  ;;  %v1354_v29 = vadd.f32 %v1353_v25, %v1160_v24 }
 0x1c2   : > { %v1355_v28 = vpop.f32.mrf.mxu1 }
 0x1c3   : > { %1580 = vst [vmem:[%s2536_s19 + $0xf0] sm:$0xff] %v1905_v26  ;;  %v1356_v30 = vadd.f32 %v1355_v28, %v1162_v27 }
 0x1c5   : > { %v1906_v31 = vpack.c.bf16 %v1356_v30, %v1354_v29 }
 0x1c7   : > { %1581 = vst [vmem:[%s2536_s19 + $0xf8] sm:$0xff] %v1906_v31 }
 0x1c8   : > { %2247 = shalt.err (!%p2244_p0)
}
 0x1c9   : > { %s2248_s4 = scalar_lea.hbm %s2574_s25, 4096  ;;  %s2252_s5 = scalar_lea.hbm %s2627_s2, 8192 }
 0x1ca   : > { %p2249_p1 = scmp.ne.s32.totalorder %s2574_s25, %s2248_s4  ;;  %p2253_p9 = scmp.lt.s32.totalorder %s2574_s25, %s2627_s2 }
 0x1cb   : > { %p2254_p11 = scmp.lt.s32.totalorder %s2252_s5, %s2248_s4 }
 0x1cc   : > { %p2250_p5 = pnand %p2249_p1, %p2642_p12 }
 0x1cd   : > { %p2255_p2 = por %p2254_p11, %p2253_p9 }
 0x1ce   : > { %p2251_p7 = pneg %p2250_p5 }
 0x1d0   : > { %p2256_p3 = pnand %p2255_p2, %p2251_p7 }
 0x1d2   : > { %2259 = shalt.err (!%p2256_p3)
}
 0x1d3   : > { %s2327_s26 = smov 128   ;;  %s2328_s17 = smov 256  }
 0x1d4   : > { %s2329_s19 = smov 8  }
 0x1d5   : > { %1914 = dma.vmem_to_hbm [thread:$0]  (%p2642_p12), %s2576_s29, 4096, %s2574_s25, %s1583_s12, %s2327_s26, %s2328_s17, %s2329_s19  }
 0x1d6 PF: > { %s2643_s22 = sld [smem:[#allocation11_spill]]  ;;  %s1614_s18 = sand.u32 1, %s2298_s9  }
 0x1d7   : > { %p2644_p13 = scmp.ne.s32.totalorder %s2637_s21, 0  ;;  %s1615_s23 = scalar_lea.sflag [#allocation4], %s1614_s18 }
 0x1dc   : > { %p2645_p4 = scmp.ge.s32.totalorder %s2643_s22, 2 }
 0x1de   : > { %p1925_p6 = pnand %p2645_p4, %p2644_p13 }
 0x1e0   : > { %p1926_p8 = pneg %p1925_p6 }
 0x1e2   : > { %2293 = dma.done.wait (%p1926_p8), %s1615_s23, 4096  }
 0x1e3   : > { %2295 = vsyncadd (%p1926_p8), %s1615_s23, 4294963200  ;;  %s19_s28 = sadd.s32 1, %s2643_s22   ;;  %s2646_s9 = smov %s2302_s10 }
 0x1e4   : > { %p16_p10 = scmp.ge.s32.totalorder %s19_s28, 4   ;;  %s2647_s10 = smov %s2306_s11 }
 0x1e5   : > { %s2648_s11 = smov %s2447_s14  ;;  %s2649_s12 = smov %s2314_s13 }
 0x1e6   : > { %s2650_s13 = smov %s2653_s27  ;;  %s2651_s14 = smov %s19_s28 }
 0x1e7   :  { %18 = sbr.rel (!%p16_p10) target bundleno = 7 (0x7), region = 79 }
 0x1ec   :  { %1620 = vsyncpa [#allocation3], 1 }
 0x1ed   :  { %1622 = vsyncpa [#allocation3 + $0x1], 1 }
 0x1ee   :  { %1623 = vsyncpa [#allocation6], 1 }
 0x1ef   :  { %1625 = vsyncpa [#allocation6 + $0x1], 1 }
 0x1f0   :  { %1626 = vsyncpa [#allocation4], 1 }
 0x1f1   :  { %1628 = vsyncpa [#allocation4 + $0x1], 1 }

</bundles_post_ra>
